<compile_context>
chip_gen: v5e
topology: v5e:2x2
jax: 0.10.0
libtpu: 0.0.40
codegen_flags: <defaults>
</compile_context>

<pallas_src>
import jax
import jax.numpy as jnp
from jax.experimental import pallas as pl
from jax.experimental.pallas import tpu as pltpu


def _outconv_kernel(w_ref, b_ref, x_ref, o_ref):
    """1x1 conv on one (1, C_in, TP) pixel tile.

    w_ref: SMEM (C_out, C_in) f32      b_ref: SMEM (C_out,) f32
    x_ref: VMEM (1, C_in, TP)          o_ref: VMEM (1, C_out, TP)
    """
    c_out, c_in = w_ref.shape
    x = x_ref[0].astype(jnp.float32)            # (C_in, TP) in vregs
    for o in range(c_out):                      # unrolled at trace time
        acc = x[0:1, :] * w_ref[o, 0] + b_ref[o]
        for c in range(1, c_in):
            acc = acc + x[c:c + 1, :] * w_ref[o, c]
        o_ref[0, o:o + 1, :] = acc.astype(o_ref.dtype)


def outconv(x_nchw, weight, bias, *, max_tile_pixels=8192):
    """1x1 Conv2d forward.

    x_nchw: (N, C_in, H, W)
    weight: (C_out, C_in, 1, 1)   (PyTorch Conv2d layout)
    bias:   (C_out,)
    returns (N, C_out, H, W)
    """
    n, c_in, h, w = x_nchw.shape
    c_out = weight.shape[0]
    hw = h * w

    # Free reshapes only — no HBM transpose passes.
    x3 = x_nchw.reshape(n, c_in, hw)
    w2 = weight.reshape(c_out, c_in).astype(jnp.float32)
    b1 = bias.reshape(c_out).astype(jnp.float32)

    # Pixel tile: whole image if it fits, otherwise 128-aligned 8192-pixel
    # tiles with a padded ragged tail (pad only materializes when needed).
    if hw <= max_tile_pixels:
        tp = hw
        hw_pad = hw
    else:
        tp = max_tile_pixels                      # multiple of 128
        hw_pad = pl.cdiv(hw, tp) * tp
        if hw_pad != hw:
            x3 = jnp.pad(x3, ((0, 0), (0, 0), (0, hw_pad - hw)))
    num_p = hw_pad // tp

    itemsize = jnp.dtype(x_nchw.dtype).itemsize
    cost = pl.CostEstimate(
        flops=2 * n * hw * c_in * c_out,
        transcendentals=0,
        bytes_accessed=n * hw * (c_in + c_out) * itemsize
        + (c_out * c_in + c_out) * 4,
    )

    out3 = pl.pallas_call(
        _outconv_kernel,
        out_shape=jax.ShapeDtypeStruct((n, c_out, hw_pad), x_nchw.dtype),
        grid_spec=pltpu.PrefetchScalarGridSpec(
            num_scalar_prefetch=0,
            grid=(n, num_p),
            in_specs=[
                # Weights / bias: whole arrays resident in SMEM, loaded once.
                pl.BlockSpec(memory_space=pltpu.MemorySpace.SMEM),
                pl.BlockSpec(memory_space=pltpu.MemorySpace.SMEM),
                # Input pixels: lane-dense (1, C_in, TP) tiles.
                pl.BlockSpec((1, c_in, tp), lambda ni, pi: (ni, 0, pi)),
            ],
            out_specs=pl.BlockSpec((1, c_out, tp), lambda ni, pi: (ni, 0, pi)),
        ),
        compiler_params=pltpu.CompilerParams(
            dimension_semantics=("parallel", "parallel"),
            vmem_limit_bytes=32 * 1024 * 1024,   # well above working set; v7x-safe
        ),
        cost_estimate=cost,
    )(w2, b1, x3)

    if hw_pad != hw:
        out3 = out3[:, :, :hw]
    return out3.reshape(n, c_out, h, w)


if __name__ == "__main__":
    # Module config: OutConv(in_ch=4, out_ch=3); input x: (2, 4, 16, 16) NCHW.
    in_ch, out_ch = 4, 3
    n, h, w = 2, 16, 16

    key = jax.random.PRNGKey(0)
    kx, kw, kb = jax.random.split(key, 3)

    x = jax.random.normal(kx, (n, in_ch, h, w), dtype=jnp.float32)
    bound = 1.0 / (in_ch ** 0.5)
    weight = jax.random.uniform(kw, (out_ch, in_ch, 1, 1),
                                minval=-bound, maxval=bound, dtype=jnp.float32)
    bias = jax.random.uniform(kb, (out_ch,),
                              minval=-bound, maxval=bound, dtype=jnp.float32)

    out = outconv(x, weight, bias)
    out = jax.block_until_ready(out)

    # Pure-JAX reference for the 1x1 conv.
    ref = jnp.einsum("nchw,oc->nohw", x, weight.reshape(out_ch, in_ch)) \
        + bias.reshape(1, out_ch, 1, 1)
    assert out.shape == (n, out_ch, h, w)
    assert jnp.allclose(out, ref, atol=1e-5, rtol=1e-5)

    print("KERNEL_OK")
</pallas_src>

<mosaic_0001>
module attributes {stable_mosaic.version = 11 : i64} {
  func.func @_outconv_kernel(%arg0: i32, %arg1: i32, %arg2: memref<3x4xf32, #tpu.memory_space<smem>>, %arg3: memref<3xf32, #tpu.memory_space<smem>>, %arg4: memref<1x4x256xf32, #tpu.memory_space<vmem>>, %arg5: memref<1x3x256xf32, #tpu.memory_space<vmem>>) attributes {dimension_semantics = [#tpu.dimension_semantics<parallel>, #tpu.dimension_semantics<parallel>], iteration_bounds = array<i64: 2, 1>, scalar_prefetch = 0 : i64, scratch_operands = 0 : i64, tpu.core_type = #tpu.core_type<tc>, window_params = [{transform_indices = @transform_0, window_bounds = array<i64: 3, 4>}, {transform_indices = @transform_1, window_bounds = array<i64: 3>}, {transform_indices = @transform_2, window_bounds = array<i64: 1, 4, 256>}, {transform_indices = @transform_3, window_bounds = array<i64: 1, 3, 256>}]} {
    %c0 = arith.constant 0 : index
    %c0_0 = arith.constant 0 : index
    %c0_1 = arith.constant 0 : index
    %0 = vector.load %arg4[%c0, %c0_0, %c0_1] : memref<1x4x256xf32, #tpu.memory_space<vmem>>, vector<1x4x256xf32>
    %1 = vector.shape_cast %0 : vector<1x4x256xf32> to vector<4x256xf32>
    %2 = vector.extract_strided_slice %1 {offsets = [0, 0], sizes = [1, 256], strides = [1, 1]} : vector<4x256xf32> to vector<1x256xf32>
    %c0_2 = arith.constant 0 : index
    %c0_3 = arith.constant 0 : index
    %3 = memref.load %arg2[%c0_2, %c0_3] : memref<3x4xf32, #tpu.memory_space<smem>>
    %4 = vector.broadcast %3 : f32 to vector<1x256xf32>
    %5 = arith.mulf %2, %4 : vector<1x256xf32>
    %c0_4 = arith.constant 0 : index
    %6 = memref.load %arg3[%c0_4] : memref<3xf32, #tpu.memory_space<smem>>
    %7 = vector.broadcast %6 : f32 to vector<1x256xf32>
    %8 = arith.addf %5, %7 : vector<1x256xf32>
    %9 = vector.extract_strided_slice %1 {offsets = [1, 0], sizes = [1, 256], strides = [1, 1]} : vector<4x256xf32> to vector<1x256xf32>
    %c0_5 = arith.constant 0 : index
    %c1 = arith.constant 1 : index
    %10 = memref.load %arg2[%c0_5, %c1] : memref<3x4xf32, #tpu.memory_space<smem>>
    %11 = vector.broadcast %10 : f32 to vector<1x256xf32>
    %12 = arith.mulf %9, %11 : vector<1x256xf32>
    %13 = arith.addf %8, %12 : vector<1x256xf32>
    %14 = vector.extract_strided_slice %1 {offsets = [2, 0], sizes = [1, 256], strides = [1, 1]} : vector<4x256xf32> to vector<1x256xf32>
    %c0_6 = arith.constant 0 : index
    %c2 = arith.constant 2 : index
    %15 = memref.load %arg2[%c0_6, %c2] : memref<3x4xf32, #tpu.memory_space<smem>>
    %16 = vector.broadcast %15 : f32 to vector<1x256xf32>
    %17 = arith.mulf %14, %16 : vector<1x256xf32>
    %18 = arith.addf %13, %17 : vector<1x256xf32>
    %19 = vector.extract_strided_slice %1 {offsets = [3, 0], sizes = [1, 256], strides = [1, 1]} : vector<4x256xf32> to vector<1x256xf32>
    %c0_7 = arith.constant 0 : index
    %c3 = arith.constant 3 : index
    %20 = memref.load %arg2[%c0_7, %c3] : memref<3x4xf32, #tpu.memory_space<smem>>
    %21 = vector.broadcast %20 : f32 to vector<1x256xf32>
    %22 = arith.mulf %19, %21 : vector<1x256xf32>
    %23 = arith.addf %18, %22 : vector<1x256xf32>
    %c0_8 = arith.constant 0 : index
    %c0_9 = arith.constant 0 : index
    %c0_10 = arith.constant 0 : index
    %24 = vector.load %arg5[%c0_8, %c0_9, %c0_10] : memref<1x3x256xf32, #tpu.memory_space<vmem>>, vector<1x1x256xf32>
    %25 = vector.shape_cast %24 : vector<1x1x256xf32> to vector<1x256xf32>
    %26 = vector.shape_cast %23 : vector<1x256xf32> to vector<1x1x256xf32>
    tpu.vector_store %arg5[%c0_8, %c0_9, %c0_10], %26 {strides = array<i32>} : memref<1x3x256xf32, #tpu.memory_space<vmem>>, vector<1x1x256xf32>,
    %27 = vector.extract_strided_slice %1 {offsets = [0, 0], sizes = [1, 256], strides = [1, 1]} : vector<4x256xf32> to vector<1x256xf32>
    %c1_11 = arith.constant 1 : index
    %c0_12 = arith.constant 0 : index
    %28 = memref.load %arg2[%c1_11, %c0_12] : memref<3x4xf32, #tpu.memory_space<smem>>
    %29 = vector.broadcast %28 : f32 to vector<1x256xf32>
    %30 = arith.mulf %27, %29 : vector<1x256xf32>
    %c1_13 = arith.constant 1 : index
    %31 = memref.load %arg3[%c1_13] : memref<3xf32, #tpu.memory_space<smem>>
    %32 = vector.broadcast %31 : f32 to vector<1x256xf32>
    %33 = arith.addf %30, %32 : vector<1x256xf32>
    %34 = vector.extract_strided_slice %1 {offsets = [1, 0], sizes = [1, 256], strides = [1, 1]} : vector<4x256xf32> to vector<1x256xf32>
    %c1_14 = arith.constant 1 : index
    %c1_15 = arith.constant 1 : index
    %35 = memref.load %arg2[%c1_14, %c1_15] : memref<3x4xf32, #tpu.memory_space<smem>>
    %36 = vector.broadcast %35 : f32 to vector<1x256xf32>
    %37 = arith.mulf %34, %36 : vector<1x256xf32>
    %38 = arith.addf %33, %37 : vector<1x256xf32>
    %39 = vector.extract_strided_slice %1 {offsets = [2, 0], sizes = [1, 256], strides = [1, 1]} : vector<4x256xf32> to vector<1x256xf32>
    %c1_16 = arith.constant 1 : index
    %c2_17 = arith.constant 2 : index
    %40 = memref.load %arg2[%c1_16, %c2_17] : memref<3x4xf32, #tpu.memory_space<smem>>
    %41 = vector.broadcast %40 : f32 to vector<1x256xf32>
    %42 = arith.mulf %39, %41 : vector<1x256xf32>
    %43 = arith.addf %38, %42 : vector<1x256xf32>
    %44 = vector.extract_strided_slice %1 {offsets = [3, 0], sizes = [1, 256], strides = [1, 1]} : vector<4x256xf32> to vector<1x256xf32>
    %c1_18 = arith.constant 1 : index
    %c3_19 = arith.constant 3 : index
    %45 = memref.load %arg2[%c1_18, %c3_19] : memref<3x4xf32, #tpu.memory_space<smem>>
    %46 = vector.broadcast %45 : f32 to vector<1x256xf32>
    %47 = arith.mulf %44, %46 : vector<1x256xf32>
    %48 = arith.addf %43, %47 : vector<1x256xf32>
    %c0_20 = arith.constant 0 : index
    %c1_21 = arith.constant 1 : index
    %c0_22 = arith.constant 0 : index
    %49 = vector.load %arg5[%c0_20, %c1_21, %c0_22] : memref<1x3x256xf32, #tpu.memory_space<vmem>>, vector<1x1x256xf32>
    %50 = vector.shape_cast %49 : vector<1x1x256xf32> to vector<1x256xf32>
    %51 = vector.shape_cast %48 : vector<1x256xf32> to vector<1x1x256xf32>
    tpu.vector_store %arg5[%c0_20, %c1_21, %c0_22], %51 {strides = array<i32>} : memref<1x3x256xf32, #tpu.memory_space<vmem>>, vector<1x1x256xf32>,
    %52 = vector.extract_strided_slice %1 {offsets = [0, 0], sizes = [1, 256], strides = [1, 1]} : vector<4x256xf32> to vector<1x256xf32>
    %c2_23 = arith.constant 2 : index
    %c0_24 = arith.constant 0 : index
    %53 = memref.load %arg2[%c2_23, %c0_24] : memref<3x4xf32, #tpu.memory_space<smem>>
    %54 = vector.broadcast %53 : f32 to vector<1x256xf32>
    %55 = arith.mulf %52, %54 : vector<1x256xf32>
    %c2_25 = arith.constant 2 : index
    %56 = memref.load %arg3[%c2_25] : memref<3xf32, #tpu.memory_space<smem>>
    %57 = vector.broadcast %56 : f32 to vector<1x256xf32>
    %58 = arith.addf %55, %57 : vector<1x256xf32>
    %59 = vector.extract_strided_slice %1 {offsets = [1, 0], sizes = [1, 256], strides = [1, 1]} : vector<4x256xf32> to vector<1x256xf32>
    %c2_26 = arith.constant 2 : index
    %c1_27 = arith.constant 1 : index
    %60 = memref.load %arg2[%c2_26, %c1_27] : memref<3x4xf32, #tpu.memory_space<smem>>
    %61 = vector.broadcast %60 : f32 to vector<1x256xf32>
    %62 = arith.mulf %59, %61 : vector<1x256xf32>
    %63 = arith.addf %58, %62 : vector<1x256xf32>
    %64 = vector.extract_strided_slice %1 {offsets = [2, 0], sizes = [1, 256], strides = [1, 1]} : vector<4x256xf32> to vector<1x256xf32>
    %c2_28 = arith.constant 2 : index
    %c2_29 = arith.constant 2 : index
    %65 = memref.load %arg2[%c2_28, %c2_29] : memref<3x4xf32, #tpu.memory_space<smem>>
    %66 = vector.broadcast %65 : f32 to vector<1x256xf32>
    %67 = arith.mulf %64, %66 : vector<1x256xf32>
    %68 = arith.addf %63, %67 : vector<1x256xf32>
    %69 = vector.extract_strided_slice %1 {offsets = [3, 0], sizes = [1, 256], strides = [1, 1]} : vector<4x256xf32> to vector<1x256xf32>
    %c2_30 = arith.constant 2 : index
    %c3_31 = arith.constant 3 : index
    %70 = memref.load %arg2[%c2_30, %c3_31] : memref<3x4xf32, #tpu.memory_space<smem>>
    %71 = vector.broadcast %70 : f32 to vector<1x256xf32>
    %72 = arith.mulf %69, %71 : vector<1x256xf32>
    %73 = arith.addf %68, %72 : vector<1x256xf32>
    %c0_32 = arith.constant 0 : index
    %c2_33 = arith.constant 2 : index
    %c0_34 = arith.constant 0 : index
    %74 = vector.load %arg5[%c0_32, %c2_33, %c0_34] : memref<1x3x256xf32, #tpu.memory_space<vmem>>, vector<1x1x256xf32>
    %75 = vector.shape_cast %74 : vector<1x1x256xf32> to vector<1x256xf32>
    %76 = vector.shape_cast %73 : vector<1x256xf32> to vector<1x1x256xf32>
    tpu.vector_store %arg5[%c0_32, %c2_33, %c0_34], %76 {strides = array<i32>} : memref<1x3x256xf32, #tpu.memory_space<vmem>>, vector<1x1x256xf32>,
    return
  }
  func.func @transform_0(%arg0: i32, %arg1: i32) -> (i32, i32) {
    %c0_i32 = arith.constant 0 : i32
    %c0_i32_0 = arith.constant 0 : i32
    %c0_i32_1 = arith.constant 0 : i32
    return %c0_i32, %c0_i32_0 : i32, i32
  }
  func.func @transform_1(%arg0: i32, %arg1: i32) -> i32 {
    %c0_i32 = arith.constant 0 : i32
    %c0_i32_0 = arith.constant 0 : i32
    return %c0_i32 : i32
  }
  func.func @transform_2(%arg0: i32, %arg1: i32) -> (i32, i32, i32) {
    %c0_i32 = arith.constant 0 : i32
    %c0_i32_0 = arith.constant 0 : i32
    return %arg0, %c0_i32, %arg1 : i32, i32, i32
  }
  func.func @transform_3(%arg0: i32, %arg1: i32) -> (i32, i32, i32) {
    %c0_i32 = arith.constant 0 : i32
    %c0_i32_0 = arith.constant 0 : i32
    return %arg0, %c0_i32, %arg1 : i32, i32, i32
  }
}

</mosaic_0001>

<bundles_post_ra>
// kernel: tpu_custom_call.1
= control target key start
LH: loop header
LB: loop body
LE: loop exit
PB: predicated region body
PF: predicated region fallthrough
CT: control target
= control target key end

     0   :  { %8 = vsyncpa [#allocation4], 0  ;;  %s876_s0 = inlined_call_operand.hbm [shape: f32[3,4], index: 0, kind: input, shape index: {}]   ;;  %s877_s1 = inlined_call_operand.hbm [shape: f32[3], index: 1, kind: input, shape index: {}]   ;;  %s878_s2 = inlined_call_operand.hbm [shape: f32[2,4,256], index: 2, kind: input, shape index: {}]   ;;  %s879_s3 = inlined_call_operand.vmem [shape: f32[2,3,256], index: 3, kind: output, shape index: {}]  }
   0x1   :  { %9 = vsyncpa [#allocation6], 0 }
   0x2   :  { %10 = vsyncpa [#allocation3], 0 }
   0x3   :  { %12 = vsyncpa [#allocation3 + $0x1], 0  ;;  %s737_s12 = smov 0   ;;  %s739_s13 = smov 0  }
   0x4   :  { %s741_s14 = smov 0   ;;  %s743_s15 = smov 0  }
   0x5   :  { %s745_s16 = smov 0   ;;  %s747_s17 = smov 0  }
   0x6 LB: > { %s476_s18 = sadd.s32 4294967295, %s713_s17   ;;  %p94_p0 = scmp.ne.s32.totalorder %s697_s13, %s693_s12  ;;  %s713_s17 = sphi %s747_s17, %s18_s17   ;;  %s709_s16 = sphi %s745_s16, %s890_s16   ;;  %s705_s15 = sphi %s743_s15, %s889_s15   ;;  %s701_s14 = sphi %s741_s14, %s888_s14   ;;  %s697_s13 = sphi %s739_s13, %s887_s13   ;;  %s693_s12 = sphi %s737_s12, %s886_s12  }
   0x7   : > { %p767_p1 = scmp.eq.s32.totalorder %s476_s18, 0  ;;  %p478_p2 = scmp.ge.s32.totalorder %s713_s17, 1 }
   0x8   : > { %p133_p3 = scmp.lt.s32.totalorder %s713_s17, 3  ;;  %s145_s23 = sshll.u32 %s876_s0, 4  ;;  %s146_s23 = int_to_ptr.hbm [resolvable:$true] %s145_s23 }
   0x9   : > { %p775_p4 = por %p767_p1, %p94_p0  ;;  %s155_s27 = sshll.u32 %s877_s1, 4  ;;  %s156_s27 = int_to_ptr.hbm [resolvable:$true] %s155_s27 }
   0xa   : > { %p782_p5 = pnand %p478_p2, %p133_p3  ;;  %s715_s28 = smov [#allocation2]  }
   0xb   : > { %s716_s29 = smov [#allocation5]   ;;  %s30_s30 = sadd.s32 1, %s709_s16 }
   0xc   : > { %p529_p6 = pneg %p782_p5  ;;  %s81_s4 = sadd.s32 1, %s701_s14 }
   0xd   : > { %p32_p8 = scmp.ge.s32.totalorder %s30_s30, 2  ;;  %p88_p9 = scmp.ne.s32.totalorder %s701_s14, %s697_s13 }
   0xe   : > { %p530_p7 = pnand %p529_p6, %p767_p1  ;;  %p89_p10 = scmp.eq.s32.totalorder %s713_s17, 0 }
   0xf   : > { %p542_p11 = scmp.lt.s32.totalorder %s713_s17, 2  ;;  %s892_s30 = smov (%p32_p8, %s30_s30), 0 }
  0x10   : > { %532 = dma.hbm_to_smem (!%p530_p7), %s146_s23, 64, %s715_s28, [#allocation4]  }
  0x11   : > { %535 = dma.hbm_to_smem (!%p530_p7), %s156_s27, 16, %s716_s29, [#allocation6]  }
  0x12   : > { %p801_p12 = por %p89_p10, %p88_p9  ;;  %s166_s6 = sand.u32 1, %s701_s14  }
  0x13   : > { %s76_s7 = ssub.s32 %s709_s16, %s892_s30  ;;  %s482_s8 = sshll.u32 %s166_s6, 3 }
  0x14   : > { %p79_p13 = scmp.eq.s32.totalorder %s76_s7, 0  ;;  %s517_s9 = sshll.u32 %s709_s16, 3 }
  0x15   : > { %s177_s18 = scalar_lea.hbm %s878_s2, %s517_s9  ;;  %s170_s21 = scalar_lea.vmem [#allocation7], %s482_s8 }
  0x16   : > { %s810_s10 = scalar_select %p79_p13, %s701_s14, %s81_s4  }
  0x17   : > { %s181_s22 = sshll.u32 %s170_s21, 4  ;;  %s179_s23 = sshll.u32 %s177_s18, 4  ;;  %s182_s22 = int_to_ptr.vmem [resolvable:$true] %s181_s22  ;;  %s180_s23 = int_to_ptr.hbm [resolvable:$true] %s179_s23 }
  0x18   : > { %p537_p0 = pnand %p542_p11, %p801_p12  ;;  %s167_s25 = scalar_lea.sflag [#allocation3], %s166_s6 }
  0x19   : > { %190 = sbr.rel (%p782_p5) target bundleno = 72 (0x48), region = 32 }
  0x1a   : > { %539 = dma.hbm_to_vmem [thread:$0]  (!%p537_p0), %s180_s23, 128, %s182_s22, %s167_s25  }
  0x1e   : > { %680 = dma.done.wait (%p767_p1), [#allocation4], 64  }
  0x1f   : > { %682 = vsyncadd (%p767_p1), [#allocation4], 4294967232 }
  0x20   : > { %684 = dma.done.wait (%p767_p1), [#allocation6], 16  }
  0x21   : > { %686 = vsyncadd (%p767_p1), [#allocation6], 4294967280  ;;  %s202_s26 = sand.u32 1, %s697_s13  }
  0x22   : > { %s488_s27 = sshll.u32 %s202_s26, 3  ;;  %s203_s28 = scalar_lea.sflag [#allocation3], %s202_s26 }
  0x23   : > { %s206_s29 = scalar_lea.vmem [#allocation7], %s488_s27 }
  0x24   : > { %688 = dma.done.wait (%p775_p4), %s203_s28, 128  }
  0x25   : > { %690 = vsyncadd (%p775_p4), %s203_s28, 4294967168 }
  0x26   : > { %212 = sfence }
  0x27   : > { %p237_p2 = scmp.lt.s32.totalorder %s705_s15, 1  ;;  %s247_s24 = sld [smem:[#allocation2]]  ;;  %v246_v0 = vld [vmem:[%s206_s29] sm:$0xff]  ;;  %v282_v19 = vlaneseq  ;;  %vm279_vm0 = vcmask 1040384  }
  0x28   : > { %s250_s4 = sld [smem:[#allocation5]] }
  0x29   : > { %s894_s15 = smov (!%p237_p2, %s705_s15), 1  ;;  %s491_s19 = sld [smem:[#allocation2 + $0x1]]  ;;  %vm842_vm1 = vcmp.lt.s32.totalorder %v282_v19, 256 }
  0x2a   : > { %s493_s5 = sld [smem:[#allocation2 + $0x2]]  ;;  %s518_s25 = sshll.u32 %s894_s15, 3 }
  0x2b   : > { %s495_s6 = sld [smem:[#allocation2 + $0x3]]  ;;  %s244_s28 = scalar_lea.vmem %s879_s3, %s518_s25 }
  0x2c   : > { %s497_s7 = sld [smem:[#allocation2 + $0x80]] }
  0x2d   : > { %v248_v1 = vstv %s247_s24  ;;  %s498_s8 = sld [smem:[#allocation5 + $0x1]] }
  0x2e   : > { %v249_v2 = vmul.f32 %v248_v1, %v246_v0  ;;  %v251_v3 = vstv %s250_s4  ;;  %s499_s9 = sld [smem:[#allocation2 + $0x81]] }
  0x2f   : > { %v254_v4 = vstv %s491_s19  ;;  %s501_s20 = sld [smem:[#allocation2 + $0x82]] }
  0x30   : > { %v252_v5 = vadd.f32 %v251_v3, %v249_v2  ;;  %v255_v6 = vmul.f32 %v254_v4, %v246_v0  ;;  %v262_v7 = vstv %s493_s5  ;;  %s503_s11 = sld [smem:[#allocation2 + $0x83]] }
  0x31   : > { %v263_v8 = vmul.f32 %v262_v7, %v246_v0  ;;  %v270_v9 = vstv %s495_s6  ;;  %s506_s12 = sld [smem:[#allocation2 + $0x100]] }
  0x32   : > { %v492_v10 = vrot.slane %v255_v6, 9  ;;  %v271_v11 = vmul.f32 %v270_v9, %v246_v0  ;;  %v288_v12 = vstv %s497_s7  ;;  %s838_s18 = sld [smem:[#allocation5 + $0x2]] }
  0x33   : > { %v494_v13 = vrot.slane %v263_v8, 10  ;;  %v289_v14 = vmul.f32 %v288_v12, %v246_v0  ;;  %v291_v15 = vstv %s498_s8  ;;  %s508_s21 = sld [smem:[#allocation2 + $0x101]] }
  0x34   : > { %v260_v16 = vadd.f32 %v492_v10, %v252_v5  ;;  %v496_v17 = vrot.slane %v271_v11, 11  ;;  %v294_v18 = vstv %s499_s9  ;;  %s510_s22 = sld [smem:[#allocation2 + $0x102]] }
  0x35   : > { %v292_v20 = vadd.f32 %v291_v15, %v289_v14  ;;  %v295_v21 = vmul.f32 %v294_v18, %v246_v0  ;;  %v302_v22 = vstv %s501_s20  ;;  %s512_s23 = sld [smem:[#allocation2 + $0x103]] }
  0x36   : > { %v268_v23 = vadd.f32 %v494_v13, %v260_v16  ;;  %v303_v24 = vmul.f32 %v302_v22, %v246_v0  ;;  %v310_v25 = vstv %s503_s11 }
  0x37   : > { %v500_v26 = vrot.slane %v295_v21, 9  ;;  %v311_v27 = vmul.f32 %v310_v25, %v246_v0  ;;  %v324_v28 = vstv %s506_s12 }
  0x38   : > { %v276_v29 = vadd.f32 %v496_v17, %v268_v23  ;;  %v502_v30 = vrot.slane %v303_v24, 10  ;;  %v325_v31 = vmul.f32 %v324_v28, %v246_v0  ;;  %v327_v32 = vstv %s838_s18 }
  0x39   : > { %v300_v34 = vadd.f32 %v500_v26, %v292_v20  ;;  %v504_v35 = vrot.slane %v311_v27, 11  ;;  %v330_v36 = vstv %s508_s21 }
  0x3a   : > { %v278_v37 = vrot.slane %v276_v29, 3  ;;  %v328_v38 = vadd.f32 %v327_v32, %v325_v31  ;;  %v331_v39 = vmul.f32 %v330_v36, %v246_v0  ;;  %v338_v40 = vstv %s510_s22 }
  0x3b   : > { %v308_v41 = vadd.f32 %v502_v30, %v300_v34  ;;  %v339_v42 = vmul.f32 %v338_v40, %v246_v0  ;;  %v346_v43 = vstv %s512_s23 }
  0x3c   : > { %v280_v44 = vsel %vm279_vm0, %v276_v29, %v278_v37  ;;  %v509_v45 = vrot.slane %v331_v39, 9  ;;  %v347_v46 = vmul.f32 %v346_v43, %v246_v0 }
  0x3d   : > { %286 = vst.msk [vmem:[%s244_s28] ss:$4 sm:$0x3] %vm842_vm1, %v280_v44  ;;  %v316_v47 = vadd.f32 %v504_v35, %v308_v41  ;;  %v511_v48 = vrot.slane %v339_v42, 10 }
  0x3e   : > { %v336_v49 = vadd.f32 %v509_v45, %v328_v38  ;;  %v513_v50 = vrot.slane %v347_v46, 11 }
  0x3f   : > { %v318_v51 = vrot.slane %v316_v47, 3 }
  0x40   : > { %v344_v52 = vadd.f32 %v511_v48, %v336_v49 }
  0x41   : > { %v319_v53 = vsel %vm279_vm0, %v316_v47, %v318_v51 }
  0x42   : > { %505 = vst.msk [vmem:[%s244_s28 + $0x1] ss:$4 sm:$0x3] %vm842_vm1, %v319_v53  ;;  %v352_v54 = vadd.f32 %v513_v50, %v344_v52 }
  0x44   : > { %v354_v55 = vrot.slane %v352_v54, 3 }
  0x46   : > { %v355_v56 = vsel %vm279_vm0, %v352_v54, %v354_v55 }
  0x47   : > { %514 = vst.msk [vmem:[%s244_s28 + $0x2] ss:$4 sm:$0x3] %vm842_vm1, %v355_v56 }
  0x48 PF: > { %s18_s17 = sadd.s32 1, %s713_s17   ;;  %s886_s12 = smov %s697_s13 }
  0x49   : > { %p15_p1 = scmp.ge.s32.totalorder %s18_s17, 4   ;;  %s887_s13 = smov %s701_s14 }
  0x4a   : > { %s888_s14 = smov %s810_s10  ;;  %s889_s15 = smov %s709_s16 }
  0x4b   : > { %s890_s16 = smov %s892_s30  ;;  %17 = sbr.rel (!%p15_p1) target bundleno = 6 (0x6), region = 83 }
  0x50   :  { %389 = vsyncpa [#allocation3], 1 }
  0x51   :  { %391 = vsyncpa [#allocation3 + $0x1], 1 }
  0x52   :  { %392 = vsyncpa [#allocation4], 1 }
  0x53   :  { %394 = vsyncpa [#allocation4 + $0x1], 1 }
  0x54   :  { %395 = vsyncpa [#allocation6], 1 }

</bundles_post_ra>
